<compile_context>
chip_gen: v7x
topology: tpu7x:2x2x1
jax: 0.10.0
libtpu: 0.0.40
codegen_flags: <defaults>
</compile_context>

<pallas_src>
import numpy as np
import jax
import jax.numpy as jnp
from jax.experimental import pallas as pl
from jax.experimental.pallas import tpu as pltpu


# ----------------------------------------------------------------------------
# Host-side: 1-D interpolation operators matching PyTorch F.interpolate.
# ----------------------------------------------------------------------------
def _interp_matrix(out_size: int, in_size: int, mode: str, align_corners) -> np.ndarray:
    """Return M (out_size, in_size) so that y = M @ x resamples a 1-D signal."""
    m = np.zeros((out_size, in_size), dtype=np.float64)
    i = np.arange(out_size, dtype=np.float64)
    if mode == "nearest":
        # PyTorch legacy 'nearest' (floor(i * in/out)), NOT 'nearest-exact'.
        src = np.floor(i * (in_size / out_size)).astype(np.int64)
        src = np.clip(src, 0, in_size - 1)
        m[np.arange(out_size), src] = 1.0
    elif mode in ("bilinear", "linear"):
        if align_corners:
            scale = (in_size - 1) / (out_size - 1) if out_size > 1 else 0.0
            src = i * scale
        else:
            src = (i + 0.5) * (in_size / out_size) - 0.5
            src = np.maximum(src, 0.0)          # PyTorch clamps negative src to 0
        i0 = np.minimum(np.floor(src).astype(np.int64), in_size - 1)
        i1 = np.minimum(i0 + 1, in_size - 1)
        frac = src - i0
        m[np.arange(out_size), i0] += 1.0 - frac
        m[np.arange(out_size), i1] += frac
    else:
        raise NotImplementedError(f"Upsample mode '{mode}' not supported")
    return m.astype(np.float32)


# ----------------------------------------------------------------------------
# Generation-aware sizing helpers.
# ----------------------------------------------------------------------------
def _device_kind() -> str:
    try:
        return jax.devices()[0].device_kind.lower()
    except Exception:
        return ""


def _is_multi_tensorcore(kind: str) -> bool:
    # 2 TensorCores per chip: v4 / v5p megacore, v7x.  v5e / v6e have 1.
    return ("v4" in kind) or ("v5p" in kind) or ("7" in kind)


def _vmem_budget(kind: str):
    """(block budget bytes, vmem_limit_bytes) per generation."""
    if ("v5 lite" in kind) or ("v5e" in kind) or ("v5lite" in kind):
        return 14 << 20, 40 << 20        # must exceed v5e's 16 MiB scoped default
    if "v6" in kind:
        return 24 << 20, 64 << 20        # 128 MiB physical, plenty of headroom
    if "7" in kind:
        return 20 << 20, 44 << 20        # 64 MiB physical: keep well under half
    return 16 << 20, 40 << 20            # conservative default (v4/v5p/unknown)


def _pick_block_rows(nc, h, w, h_out, w_out, itemsize, budget_bytes, multi_tc):
    """Number of (n,c) images per grid step, sized from a VMEM budget."""
    def rup(v, m):
        return -(-v // m) * m

    pad_w, pad_wo = rup(w, 128), rup(w_out, 128)
    sub_h, sub_ho = rup(h, 8), rup(h_out, 8)
    bytes_per_row = (
        2 * itemsize * sub_h * pad_w        # double-buffered input block
        + 2 * itemsize * sub_ho * pad_wo    # double-buffered output block
        + 4 * sub_h * pad_wo                # f32 width-pass intermediate (R, H, Wout)
        + 4 * sub_ho * pad_wo               # f32 height-pass result before output cast
    )
    fixed = 2 * 4 * (sub_ho * rup(h, 128) + rup(w, 8) * pad_wo)   # operator blocks
    cap = max(1, (budget_bytes - fixed) // bytes_per_row)
    r = max(1, min(int(cap), nc))

    if multi_tc and nc >= 2:
        # Grid axis is 'parallel' -> sharded over the 2 TensorCores: keep the
        # step count >= 2 and even so both cores get balanced work.
        steps = -(-nc // r)
        if steps == 1:
            r = -(-nc // 2)
        elif steps % 2 == 1:
            r = -(-nc // (steps + 1))
    return max(1, min(r, nc))


# ----------------------------------------------------------------------------
# Pallas kernel: separable resize on a block of R (n, c) images.
# ----------------------------------------------------------------------------
def _upsample_kernel(x_ref, wh_ref, ww_ref, o_ref):
    # x_ref : (R, H, W)     block of R (n, c) images (input dtype)
    # wh_ref: (Hout, H)     1-D height operator, f32
    # ww_ref: (W, Wout)     1-D width operator (pre-transposed), MXU dtype
    # o_ref : (R, Hout, Wout)
    r, h, w = x_ref.shape
    h_out, w_out = o_ref.shape[1], o_ref.shape[2]

    # Width pass: one fill-friendly 2-D MXU matmul (R*H, W) @ (W, Wout),
    # f32 accumulation, no explicit cast/copy of the input block.
    u = jnp.dot(
        x_ref[...].reshape(r * h, w), ww_ref[...],
        preferred_element_type=jnp.float32,
    ).reshape(r, h, w_out)

    # Height pass: contract H against the (Hout, H) operator — no broadcast;
    # the result transpose only permutes leading (non-lane) dims, which is cheap.
    y = jnp.einsum("oh,rhk->rok", wh_ref[...], u,
                   preferred_element_type=jnp.float32)

    o_ref[...] = y.astype(o_ref.dtype)


# ----------------------------------------------------------------------------
# Wrapper: NCHW in, NCHW out — matches Upsample.forward / resize().
# ----------------------------------------------------------------------------
def upsample_forward(x, size=None, scale_factor=None, mode="nearest",
                     align_corners=None, block_rows=None):
    n, c, h, w = x.shape
    if not size:
        # Same rule as the module: size = [int(t * scale_factor) for t in x.shape[-2:]]
        if isinstance(scale_factor, (tuple, list)):
            sf_h, sf_w = float(scale_factor[0]), float(scale_factor[1])
        else:
            sf_h = sf_w = float(scale_factor)
        h_out, w_out = int(h * sf_h), int(w * sf_w)
    else:
        if isinstance(size, (tuple, list)):
            h_out, w_out = int(size[0]), int(size[1])
        else:
            h_out = w_out = int(size)

    x_dtype = jnp.dtype(x.dtype)
    itemsize = x_dtype.itemsize
    # For 16-bit float inputs, run the MXU natively in that dtype (f32 acc).
    mxu_dtype = x.dtype if x_dtype in (jnp.dtype(jnp.bfloat16), jnp.dtype(jnp.float16)) \
        else jnp.float32

    wh = jnp.asarray(_interp_matrix(h_out, h, mode, align_corners),
                     dtype=jnp.float32)                                  # (Hout, H)
    ww_t = jnp.asarray(_interp_matrix(w_out, w, mode, align_corners).T,
                       dtype=mxu_dtype)                                  # (W, Wout)

    nc = n * c
    kind = _device_kind()
    multi_tc = _is_multi_tensorcore(kind)
    budget_bytes, vmem_limit = _vmem_budget(kind)
    r = block_rows if block_rows else _pick_block_rows(
        nc, h, w, h_out, w_out, itemsize, budget_bytes, multi_tc)
    r = max(1, min(int(r), nc))

    x_rows = x.reshape(nc, h, w)                                         # free reshape
    grid = (pl.cdiv(nc, r),)                                             # ragged tail OK

    flops = 2 * nc * w_out * h * (w + h_out)
    bytes_accessed = (itemsize * nc * (h * w + h_out * w_out)
                      + 4 * h_out * h + jnp.dtype(ww_t.dtype).itemsize * w * w_out)

    out_rows = pl.pallas_call(
        _upsample_kernel,
        out_shape=jax.ShapeDtypeStruct((nc, h_out, w_out), x.dtype),
        grid_spec=pltpu.PrefetchScalarGridSpec(
            num_scalar_prefetch=0,
            grid=grid,
            in_specs=[
                pl.BlockSpec((r, h, w), lambda i: (i, 0, 0)),        # image block
                pl.BlockSpec((h_out, h), lambda i: (0, 0)),          # Wh
                pl.BlockSpec((w, w_out), lambda i: (0, 0)),          # Ww^T
            ],
            out_specs=pl.BlockSpec((r, h_out, w_out), lambda i: (i, 0, 0)),
        ),
        compiler_params=pltpu.CompilerParams(
            dimension_semantics=("parallel",),
            vmem_limit_bytes=int(vmem_limit),
        ),
        cost_estimate=pl.CostEstimate(
            flops=int(flops), transcendentals=0,
            bytes_accessed=int(bytes_accessed)),
    )(x_rows, wh, ww_t)

    return out_rows.reshape(n, c, h_out, w_out)                          # free reshape


# ----------------------------------------------------------------------------
# Demo / self-check
# ----------------------------------------------------------------------------
if __name__ == "__main__":
    N, C, H, W = 2, 4, 16, 16
    key = jax.random.PRNGKey(0)
    x = jax.random.normal(key, (N, C, H, W), dtype=jnp.float32)

    # Typical UNet usage: Upsample(scale_factor=2, mode='bilinear', align_corners=False)
    out = upsample_forward(x, scale_factor=2, mode="bilinear", align_corners=False)
    out = jax.block_until_ready(out)
    assert out.shape == (N, C, 2 * H, 2 * W), out.shape
    wh = jnp.asarray(_interp_matrix(2 * H, H, "bilinear", False))
    ww = jnp.asarray(_interp_matrix(2 * W, W, "bilinear", False))
    ref = jnp.einsum("oh,nchw,pw->ncop", wh, x, ww)
    np.testing.assert_allclose(np.asarray(out), np.asarray(ref), rtol=1e-4, atol=1e-4)

    # Module-default mode: Upsample(scale_factor=2, mode='nearest')
    out_n = upsample_forward(x, scale_factor=2, mode="nearest")
    out_n = jax.block_until_ready(out_n)
    assert out_n.shape == (N, C, 2 * H, 2 * W), out_n.shape
    whn = jnp.asarray(_interp_matrix(2 * H, H, "nearest", None))
    wwn = jnp.asarray(_interp_matrix(2 * W, W, "nearest", None))
    ref_n = jnp.einsum("oh,nchw,pw->ncop", whn, x, wwn)
    np.testing.assert_allclose(np.asarray(out_n), np.asarray(ref_n), rtol=1e-4, atol=1e-4)

    # Ragged cdiv grid (N*C not a multiple of the block) + explicit `size` + align_corners
    x2 = jax.random.normal(jax.random.PRNGKey(1), (1, 5, 16, 16), dtype=jnp.float32)
    out_r = upsample_forward(x2, size=(24, 24), mode="bilinear",
                             align_corners=True, block_rows=2)
    out_r = jax.block_until_ready(out_r)
    assert out_r.shape == (1, 5, 24, 24), out_r.shape
    whr = jnp.asarray(_interp_matrix(24, 16, "bilinear", True))
    wwr = jnp.asarray(_interp_matrix(24, 16, "bilinear", True))
    ref_r = jnp.einsum("oh,nchw,pw->ncop", whr, x2, wwr)
    np.testing.assert_allclose(np.asarray(out_r), np.asarray(ref_r), rtol=1e-4, atol=1e-4)

    print("KERNEL_OK")
</pallas_src>

<mosaic_0001>
module attributes {stable_mosaic.version = 11 : i64} {
  func.func @_upsample_kernel(%arg0: i32, %arg1: memref<8x16x16xf32, #tpu.memory_space<vmem>>, %arg2: memref<32x16xf32, #tpu.memory_space<vmem>>, %arg3: memref<16x32xf32, #tpu.memory_space<vmem>>, %arg4: memref<8x32x32xf32, #tpu.memory_space<vmem>>) attributes {dimension_semantics = [#tpu.dimension_semantics<parallel>], iteration_bounds = array<i64: 1>, scalar_prefetch = 0 : i64, scratch_operands = 0 : i64, tpu.core_type = #tpu.core_type<tc>, window_params = [{transform_indices = @transform_0, window_bounds = array<i64: 8, 16, 16>}, {pipeline_mode = #tpu.pipeline_mode<synchronous>, transform_indices = @transform_1, window_bounds = array<i64: 32, 16>}, {pipeline_mode = #tpu.pipeline_mode<synchronous>, transform_indices = @transform_2, window_bounds = array<i64: 16, 32>}, {transform_indices = @transform_3, window_bounds = array<i64: 8, 32, 32>}]} {
    %c0 = arith.constant 0 : index
    %c0_0 = arith.constant 0 : index
    %c0_1 = arith.constant 0 : index
    %0 = vector.load %arg1[%c0, %c0_0, %c0_1] : memref<8x16x16xf32, #tpu.memory_space<vmem>>, vector<8x16x16xf32>
    %1 = vector.shape_cast %0 : vector<8x16x16xf32> to vector<128x16xf32>
    %c0_2 = arith.constant 0 : index
    %c0_3 = arith.constant 0 : index
    %2 = vector.load %arg3[%c0_2, %c0_3] : memref<16x32xf32, #tpu.memory_space<vmem>>, vector<16x32xf32>
    %cst = arith.constant dense<0.000000e+00> : vector<128x32xf32>
    %3 = tpu.matmul %1, %2, %cst {dimension_numbers = #tpu.dot_dimension_numbers<[1], [0], [0], [1], [0, 0, 1, 1], [], []>} : vector<128x16xf32>, vector<16x32xf32>, vector<128x32xf32> -> vector<128x32xf32>
    %4 = vector.shape_cast %3 : vector<128x32xf32> to vector<8x16x32xf32>
    %c0_4 = arith.constant 0 : index
    %c0_5 = arith.constant 0 : index
    %5 = vector.load %arg2[%c0_4, %c0_5] : memref<32x16xf32, #tpu.memory_space<vmem>>, vector<32x16xf32>
    "tpu.trace_start"() <{level = 10 : i32, message = "oh,rhk->rok"}> : () -> ()
    %cst_6 = arith.constant dense<0.000000e+00> : vector<8x32x32xf32>
    %6 = tpu.matmul %4, %5, %cst_6 {dimension_numbers = #tpu.dot_dimension_numbers<[1], [1], [0, 2], [0], [0, 0, 0, 2, 1, 0], [], []>} : vector<8x16x32xf32>, vector<32x16xf32>, vector<8x32x32xf32> -> vector<8x32x32xf32>
    %7 = tpu.transpose %6, [0, 2, 1] : vector<8x32x32xf32> -> vector<8x32x32xf32>
    "tpu.trace_stop"() : () -> ()
    %c0_7 = arith.constant 0 : index
    %c0_8 = arith.constant 0 : index
    %c0_9 = arith.constant 0 : index
    %8 = vector.load %arg4[%c0_7, %c0_8, %c0_9] : memref<8x32x32xf32, #tpu.memory_space<vmem>>, vector<8x32x32xf32>
    tpu.vector_store %arg4[%c0_7, %c0_8, %c0_9], %7 {strides = array<i32>} : memref<8x32x32xf32, #tpu.memory_space<vmem>>, vector<8x32x32xf32>,
    return
  }
  func.func @transform_0(%arg0: i32) -> (i32, i32, i32) {
    %c0_i32 = arith.constant 0 : i32
    %c0_i32_0 = arith.constant 0 : i32
    %c0_i32_1 = arith.constant 0 : i32
    return %arg0, %c0_i32, %c0_i32_0 : i32, i32, i32
  }
  func.func @transform_1(%arg0: i32) -> (i32, i32) {
    %c0_i32 = arith.constant 0 : i32
    %c0_i32_0 = arith.constant 0 : i32
    %c0_i32_1 = arith.constant 0 : i32
    return %c0_i32, %c0_i32_0 : i32, i32
  }
  func.func @transform_2(%arg0: i32) -> (i32, i32) {
    %c0_i32 = arith.constant 0 : i32
    %c0_i32_0 = arith.constant 0 : i32
    %c0_i32_1 = arith.constant 0 : i32
    return %c0_i32, %c0_i32_0 : i32, i32
  }
  func.func @transform_3(%arg0: i32) -> (i32, i32, i32) {
    %c0_i32 = arith.constant 0 : i32
    %c0_i32_0 = arith.constant 0 : i32
    %c0_i32_1 = arith.constant 0 : i32
    return %arg0, %c0_i32, %c0_i32_0 : i32, i32, i32
  }
}

</mosaic_0001>

<bundles_post_ra>
// kernel: tpu_custom_call.1
= control target key start
LH: loop header
LB: loop body
LE: loop exit
PB: predicated region body
PF: predicated region fallthrough
CT: control target
= control target key end

     0   :  { %8 = vsyncpa [#allocation3], 0  ;;  %s1577_s0 = inlined_call_operand.hbm [shape: f32[8,16,16], index: 0, kind: input, shape index: {}]   ;;  %s1578_s1 = inlined_call_operand.vmem [shape: f32[32,16], index: 1, kind: input, shape index: {}]   ;;  %s1579_s2 = inlined_call_operand.vmem [shape: f32[16,32], index: 2, kind: input, shape index: {}]   ;;  %s1580_s3 = inlined_call_operand.hbm [shape: f32[8,32,32], index: 3, kind: output, shape index: {}]  }
   0x1   :  { %9 = vsyncpa [#allocation4], 0  ;;  %s1403_s12 = smov [#allocation2]   ;;  %s1355_s16 = scalar_lea.hbm %s1577_s0, 2048 }
   0x2   :  { %s15_s13 = sshll.u32 %s1403_s12, 4  ;;  %p1356_p0 = scmp.ne.s32.totalorder %s1577_s0, %s1355_s16  ;;  %s16_s13 = int_to_ptr.vmem [resolvable:$true] %s15_s13 }
   0x3   :  { %p1359_p1 = scmp.lt.u32.totalorder %s1355_s16, %s1577_s0 }
   0x5   :  { %p1361_p2 = pnand %p1359_p1, %p1356_p0 }
   0x7   :  { %1364 = shalt.err (!%p1361_p2)
}
   0x8   :  { %s1365_s21 = scalar_lea.vmem %s16_s13, 2048  ;;  %p1370_p4 = scmp.lt.s32.totalorder %s16_s13, %s16_s13 }
   0x9   :  { %p1366_p3 = scmp.ne.s32.totalorder %s16_s13, %s1365_s21  ;;  %p1371_p5 = scmp.lt.s32.totalorder %s1365_s21, %s1365_s21 }
   0xb   :  { %p1372_p6 = por %p1371_p5, %p1370_p4 }
   0xd   :  { %p1373_p7 = pnand %p1372_p6, %p1366_p3 }
   0xf   :  { %1376 = shalt.err (!%p1373_p7)
}
  0x10   :  { %s1404_s22 = smov 128   ;;  %s1405_s23 = smov 8  }
  0x11   :  { %21 = dma.hbm_to_vmem [thread:$0]  %s1577_s0, 2048, %s16_s13, [#allocation3], %s1404_s22, %s1404_s22, %s1405_s23  }
  0x12   :  { %1399 = dma.done.wait [#allocation3], 2048  }
  0x13   :  { %1400 = vsyncadd [#allocation3], 4294965248  ;;  %vm47_vm0 = vcmask 130048   ;;  %v45_v0 = vld [vmem:[%s1579_s2] sm:$0xff]  ;;  %v46_v1 = vld [vmem:[%s1579_s2 + $0x8] sm:$0xff]  ;;  %vm1090_vm2 = vcmask 261120  }
  0x14   :  { %v29_v2 = vld [vmem:[#allocation2] sm:$0xff]  ;;  %v1330_v3 = vpack.c.bf16 %v46_v1, %v45_v0  ;;  %v30_v4 = vld [vmem:[#allocation2 + $0x8] sm:$0xff]  ;;  %v31_v5 = vld [vmem:[#allocation2 + $0x10] sm:$0xff] }
  0x15   :  { %1250 = vmatprep.mubr.msk.f32.mxu0 %vm47_vm0, %v29_v2  ;;  %v32_v6 = vld [vmem:[#allocation2 + $0x18] sm:$0xff]  ;;  %v33_v7 = vld [vmem:[#allocation2 + $0x20] sm:$0xff]  ;;  %v34_v8 = vld [vmem:[#allocation2 + $0x28] sm:$0xff] }
  0x16   :  { %1331 = vmatprep.subr.bf16.mxu0 %v1330_v3  ;;  %v35_v9 = vld [vmem:[#allocation2 + $0x30] sm:$0xff]  ;;  %v36_v10 = vld [vmem:[#allocation2 + $0x38] sm:$0xff]  ;;  %v37_v11 = vld [vmem:[#allocation2 + $0x40] sm:$0xff] }
  0x17   :  { %1333 = vmatpush3.bf16.msra.mxu0 %v1330_v3  ;;  %v38_v12 = vld [vmem:[#allocation2 + $0x48] sm:$0xff]  ;;  %v39_v13 = vld [vmem:[#allocation2 + $0x50] sm:$0xff]  ;;  %v40_v14 = vld [vmem:[#allocation2 + $0x58] sm:$0xff] }
  0x18   :  { %v41_v15 = vld [vmem:[#allocation2 + $0x60] sm:$0xff]  ;;  %v42_v16 = vld [vmem:[#allocation2 + $0x68] sm:$0xff]  ;;  %v43_v17 = vld [vmem:[#allocation2 + $0x70] sm:$0xff] }
  0x19   :  { %v44_v18 = vld [vmem:[#allocation2 + $0x78] sm:$0xff]  ;;  %v241_v19 = vld [vmem:[%s1578_s1] sm:$0xff]  ;;  %v242_v20 = vld [vmem:[%s1578_s1 + $0x8] sm:$0xff] }
  0x1a   :  { %1251 = vmatmul.mubr.msk.f32.vlgmr.msra.gmra.mrb[0].mxu0 %vm47_vm0, %v30_v4  ;;  %vm1472_vm1 = vmpackc.low %vm47_vm0, %vm47_vm0  ;;  %v1334_v22 = vpack.c.bf16 %v242_v20, %v241_v19  ;;  %v243_v30 = vld [vmem:[%s1578_s1 + $0x10] sm:$0xff]  ;;  %v244_v31 = vld [vmem:[%s1578_s1 + $0x18] sm:$0xff]  ;;  %s1406_s1 = smov [#allocation5]  }
  0x1b   :  { %1253 = vmatprep.mubr.msk.f32.mxu0 %vm47_vm0, %v31_v5  ;;  %v1340_v33 = vpack.c.bf16 %v244_v31, %v243_v30  ;;  %s1128_s9 = sshll.u32 %s1406_s1, 4  ;;  %s1129_s9 = int_to_ptr.vmem [resolvable:$true] %s1128_s9 }
  0x1c   :  { %1346 = vmatprep.subr.msk.bf16.mxu1 %vm1472_vm1, %v1334_v22  ;;  %1336 = vmatprep.subr.msk.bf16.mxu0 %vm1472_vm1, %v1334_v22  ;;  %s1377_s10 = scalar_lea.vmem %s1129_s9, 4096  ;;  %p1382_p9 = scmp.lt.s32.totalorder %s1129_s9, %s1129_s9 }
  0x1d   :  { %1348 = vmatpush3.bf16.xpose.msk.msra.mxu1 %vm1472_vm1, %v1334_v22  ;;  %p1378_p8 = scmp.ne.s32.totalorder %s1129_s9, %s1377_s10  ;;  %p1383_p10 = scmp.lt.s32.totalorder %s1377_s10, %s1377_s10 }
  0x1e   :  { %1254 = vmatmul.mubr.msk.f32.gmra.mrb[2].mxu0 %vm47_vm0, %v32_v6  ;;  %1347 = vmatprep.subr.msk.bf16.mxu1 %vm1472_vm1, %v1340_v33 }
  0x1f   :  { %1256 = vmatprep.mubr.msk.f32.mxu0 %vm47_vm0, %v33_v7  ;;  %p1384_p11 = por %p1383_p10, %p1382_p9 }
  0x20   :  { %1339 = vmatpush3.bf16.xpose.msk.msra.mxu0 %vm1472_vm1, %v1334_v22 }
  0x21   :  { %1342 = vmatprep.subr.msk.bf16.mxu0 %vm1472_vm1, %v1340_v33  ;;  %p1385_p12 = pnand %p1384_p11, %p1378_p8 }
  0x22   :  { %1257 = vmatmul.mubr.msk.f32.gmra.mrb[4].mxu0 %vm47_vm0, %v34_v8 }
  0x23   :  { %1259 = vmatprep.mubr.msk.f32.mxu0 %vm47_vm0, %v35_v9 }
  0x25   :  { %1349 = vmatpush3.bf16.xpose.msk.msra.mxu1 %vm1472_vm1, %v1340_v33 }
  0x26   :  { %1260 = vmatmul.mubr.msk.f32.gmra.mrb[6].mxu0 %vm47_vm0, %v36_v10 }
  0x27   :  { %1262 = vmatprep.mubr.msk.f32.mxu0 %vm47_vm0, %v37_v11 }
  0x28   :  { %1345 = vmatpush3.bf16.xpose.msk.msra.mxu0 %vm1472_vm1, %v1340_v33 }
  0x2a   :  { %1263 = vmatmul.mubr.msk.f32.gmra.mrb[8].mxu0 %vm47_vm0, %v38_v12 }
  0x2b   :  { %1265 = vmatprep.mubr.msk.f32.mxu0 %vm47_vm0, %v39_v13 }
  0x2e   :  { %1266 = vmatmul.mubr.msk.f32.gmra.mrb[10].mxu0 %vm47_vm0, %v40_v14 }
  0x2f   :  { %1268 = vmatprep.mubr.msk.f32.mxu0 %vm47_vm0, %v41_v15 }
  0x32   :  { %1269 = vmatmul.mubr.msk.f32.gmra.mrb[12].mxu0 %vm47_vm0, %v42_v16 }
  0x33   :  { %1271 = vmatprep.mubr.msk.f32.mxu0 %vm47_vm0, %v43_v17 }
  0x36   :  { %1272 = vmatmul.mubr.msk.f32.gmra.mrb[14].mxu0 %vm47_vm0, %v44_v18 }
  0xed   :  { %v1252_v23 = vpop.f32.mrb[0].mxu0 }
  0xee   :  { %v162_v24 = vpop.f32.mrb[1].mxu0 }
  0xf1   :  { %v1255_v25 = vpop.f32.mrb[2].mxu0 }
  0xf2   :  { %v172_v26 = vpop.f32.mrb[3].mxu0 }
  0xf5   :  { %v1258_v27 = vpop.f32.mrb[4].mxu0 }
  0xf6   :  { %v182_v28 = vpop.f32.mrb[5].mxu0 }
  0xf7   :  { %309 = vxpose.xlu0.b32.start [1/2] (short) (narrow) %v182_v28, 32 }
  0xf9   :  { %v1261_v29 = vpop.f32.mrb[6].mxu0 }
  0xfa   :  { %v192_v32 = vpop.f32.mrb[7].mxu0 }
  0xfb   :  { %310 = vxpose.xlu0.b32.end [2/2] (short) (narrow) %v1258_v27, 32  ;;  %341 = vxpose.xlu1.b32.start [1/2] (short) (narrow) %v192_v32, 32 }
  0xfd   :  { %v1264_v34 = vpop.f32.mrb[8].mxu0 }
  0xfe   :  { %v202_v35 = vpop.f32.mrb[9].mxu0 }
  0xff   :  { %342 = vxpose.xlu1.b32.end [2/2] (short) (narrow) %v1261_v29, 32 }
 0x101   :  { %v1267_v36 = vpop.f32.mrb[10].mxu0 }
 0x102   :  { %v212_v37 = vpop.f32.mrb[11].mxu0 }
 0x104   :  { %373 = vxpose.xlu0.b32.start [1/2] (short) (narrow) %v202_v35, 32 }
 0x105   :  { %v1270_v38 = vpop.f32.mrb[12].mxu0 }
 0x106   :  { %v222_v39 = vpop.f32.mrb[13].mxu0 }
 0x108   :  { %245 = vxpose.xlu1.b32.start [1/2] (short) (narrow) %v162_v24, 32  ;;  %374 = vxpose.xlu0.b32.end [2/2] (short) (narrow) %v1264_v34, 32 }
 0x109   :  { %v1273_v40 = vpop.f32.mrb[14].mxu0 }
 0x10a   :  { %v232_v41 = vpop.f32.mrb[15].mxu0 }
 0x10c   :  { %246 = vxpose.xlu1.b32.end [2/2] (short) (narrow) %v1252_v23, 32 }
 0x111   :  { %405 = vxpose.xlu0.b32.start [1/2] (short) (narrow) %v212_v37, 32 }
 0x115   :  { %277 = vxpose.xlu1.b32.start [1/2] (short) (narrow) %v172_v26, 32  ;;  %406 = vxpose.xlu0.b32.end [2/2] (short) (narrow) %v1267_v36, 32 }
 0x119   :  { %278 = vxpose.xlu1.b32.end [2/2] (short) (narrow) %v1255_v25, 32 }
 0x11e   :  { %437 = vxpose.xlu0.b32.start [1/2] (short) (narrow) %v222_v39, 32 }
 0x122   :  { %438 = vxpose.xlu0.b32.end [2/2] (short) (narrow) %v1270_v38, 32  ;;  %469 = vxpose.xlu1.b32.start [1/2] (short) (narrow) %v232_v41, 32 }
 0x126   :  { %470 = vxpose.xlu1.b32.end [2/2] (short) (narrow) %v1273_v40, 32 }
 0x177   :  { %v325_v42 = vpop.trf.xlu0 }
 0x17b   :  { %v326_v43 = vpop.trf.xlu0  ;;  %v357_v44 = vpop.trf.xlu1 }
 0x17f   :  { %v327_v45 = vpop.trf.xlu0  ;;  %v358_v46 = vpop.trf.xlu1 }
 0x180   :  { %1297 = vmatprep.mubr.msk.f32.mxu1 %vm47_vm0, %v327_v45 }
 0x183   :  { %v328_v47 = vpop.trf.xlu0  ;;  %v359_v48 = vpop.trf.xlu1 }
 0x184   :  { %1298 = vmatmul.mubr.msk.f32.vlgmr.msra.gmra.mrb[0].mxu1 %vm47_vm0, %v328_v47 }
 0x185   :  { %1300 = vmatprep.mubr.msk.f32.mxu1 %vm47_vm0, %v357_v44 }
 0x187   :  { %v360_v49 = vpop.trf.xlu1  ;;  %v389_v50 = vpop.trf.xlu0 }
 0x188   :  { %1301 = vmatmul.mubr.msk.f32.gmra.mrb[2].mxu1 %vm47_vm0, %v358_v46 }
 0x189   :  { %1303 = vmatprep.mubr.msk.f32.mxu1 %vm47_vm0, %v359_v48 }
 0x18b   :  { %v261_v51 = vpop.trf.xlu1  ;;  %v390_v52 = vpop.trf.xlu0 }
 0x18c   :  { %1282 = vmatprep.mubr.msk.f32.mxu0 %vm47_vm0, %v261_v51  ;;  %1304 = vmatmul.mubr.msk.f32.gmra.mrb[4].mxu1 %vm47_vm0, %v360_v49 }
 0x18d   :  { %1306 = vmatprep.mubr.msk.f32.mxu1 %vm47_vm0, %v389_v50 }
 0x18f   :  { %v262_v53 = vpop.trf.xlu1  ;;  %v391_v54 = vpop.trf.xlu0 }
 0x190   :  { %1283 = vmatmul.mubr.msk.f32.vlgmr.msra.gmra.mrb[16].mxu0 %vm47_vm0, %v262_v53  ;;  %1307 = vmatmul.mubr.msk.f32.gmra.mrb[6].mxu1 %vm47_vm0, %v390_v52 }
 0x191   :  { %1309 = vmatprep.mubr.msk.f32.mxu1 %vm47_vm0, %v391_v54 }
 0x193   :  { %v263_v55 = vpop.trf.xlu1  ;;  %v392_v56 = vpop.trf.xlu0 }
 0x194   :  { %1285 = vmatprep.mubr.msk.f32.mxu0 %vm47_vm0, %v263_v55  ;;  %1310 = vmatmul.mubr.msk.f32.gmra.mrb[8].mxu1 %vm47_vm0, %v392_v56 }
 0x197   :  { %v264_v57 = vpop.trf.xlu1  ;;  %v421_v58 = vpop.trf.xlu0 }
 0x198   :  { %1286 = vmatmul.mubr.msk.f32.gmra.mrb[18].mxu0 %vm47_vm0, %v264_v57  ;;  %1312 = vmatprep.mubr.msk.f32.mxu1 %vm47_vm0, %v421_v58 }
 0x19b   :  { %v293_v59 = vpop.trf.xlu1  ;;  %v422_v60 = vpop.trf.xlu0 }
 0x19c   :  { %1288 = vmatprep.mubr.msk.f32.mxu0 %vm47_vm0, %v293_v59  ;;  %1313 = vmatmul.mubr.msk.f32.gmra.mrb[10].mxu1 %vm47_vm0, %v422_v60 }
 0x19f   :  { %v294_v61 = vpop.trf.xlu1  ;;  %v423_v62 = vpop.trf.xlu0 }
 0x1a0   :  { %1289 = vmatmul.mubr.msk.f32.gmra.mrb[20].mxu0 %vm47_vm0, %v294_v61  ;;  %1315 = vmatprep.mubr.msk.f32.mxu1 %vm47_vm0, %v423_v62 }
 0x1a3   :  { %v295_v63 = vpop.trf.xlu1  ;;  %v424_v0 = vpop.trf.xlu0 }
 0x1a4   :  { %1291 = vmatprep.mubr.msk.f32.mxu0 %vm47_vm0, %v295_v63  ;;  %1316 = vmatmul.mubr.msk.f32.gmra.mrb[12].mxu1 %vm47_vm0, %v424_v0 }
 0x1a7   :  { %v296_v1 = vpop.trf.xlu1  ;;  %v453_v2 = vpop.trf.xlu0 }
 0x1a8   :  { %1292 = vmatmul.mubr.msk.f32.gmra.mrb[22].mxu0 %vm47_vm0, %v296_v1  ;;  %1318 = vmatprep.mubr.msk.f32.mxu1 %vm47_vm0, %v453_v2 }
 0x1a9   :  { %1294 = vmatprep.mubr.msk.f32.mxu0 %vm47_vm0, %v325_v42 }
 0x1ab   :  { %v454_v3 = vpop.trf.xlu0  ;;  %v485_v4 = vpop.trf.xlu1 }
 0x1ac   :  { %1295 = vmatmul.mubr.msk.f32.gmra.mrb[24].mxu0 %vm47_vm0, %v326_v43  ;;  %1319 = vmatmul.mubr.msk.f32.gmra.mrb[14].mxu1 %vm47_vm0, %v454_v3 }
 0x1af   :  { %v455_v5 = vpop.trf.xlu0  ;;  %v486_v6 = vpop.trf.xlu1 }
 0x1b0   :  { %1321 = vmatprep.mubr.msk.f32.mxu1 %vm47_vm0, %v455_v5 }
 0x1b3   :  { %v456_v7 = vpop.trf.xlu0  ;;  %v487_v8 = vpop.trf.xlu1 }
 0x1b4   :  { %1322 = vmatmul.mubr.msk.f32.gmra.mrb[16].mxu1 %vm47_vm0, %v456_v7 }
 0x1b5   :  { %1324 = vmatprep.mubr.msk.f32.mxu1 %vm47_vm0, %v485_v4 }
 0x1b7   :  { %v488_v9 = vpop.trf.xlu1 }
 0x1b8   :  { %1325 = vmatmul.mubr.msk.f32.gmra.mrb[18].mxu1 %vm47_vm0, %v486_v6 }
 0x1b9   :  { %1327 = vmatprep.mubr.msk.f32.mxu1 %vm47_vm0, %v487_v8 }
 0x1bc   :  { %1328 = vmatmul.mubr.msk.f32.gmra.mrb[20].mxu1 %vm47_vm0, %v488_v9 }
 0x257   :  { %v1299_v10 = vpop.f32.mrb[0].mxu1 }
 0x258   :  { %v725_v11 = vpop.f32.mrb[1].mxu1 }
 0x25b   :  { %v1302_v12 = vpop.f32.mrb[2].mxu1 }
 0x25c   :  { %v735_v13 = vpop.f32.mrb[3].mxu1 }
 0x25f   :  { %v1305_v14 = vpop.f32.mrb[4].mxu1 }
 0x260   :  { %v745_v15 = vpop.f32.mrb[5].mxu1 }
 0x263   :  { %v1284_v16 = vpop.f32.mrb[16].mxu0  ;;  %v1308_v17 = vpop.f32.mrb[6].mxu1 }
 0x264   :  { %v675_v18 = vpop.f32.mrb[17].mxu0  ;;  %v755_v19 = vpop.f32.mrb[7].mxu1 }
 0x265   :  { %834 = vxpose.xlu0.b32.start [1/4] (short) (narrow) %v675_v18, 32 }
 0x267   :  { %v1311_v20 = vpop.f32.mrb[8].mxu1 }
 0x268   :  { %v765_v21 = vpop.f32.mrb[9].mxu1 }
 0x269   :  { %835 = vxpose.xlu0.b32.cont [2/4] (short) (narrow) %v1284_v16, 32 }
 0x26b   :  { %v1287_v22 = vpop.f32.mrb[18].mxu0 }
 0x26c   :  { %v685_v23 = vpop.f32.mrb[19].mxu0 }
 0x26d   :  { %836 = vxpose.xlu0.b32.cont [3/4] (short) (narrow) %v685_v23, 32 }
 0x26f   :  { %v1314_v24 = vpop.f32.mrb[10].mxu1 }
 0x270   :  { %v775_v25 = vpop.f32.mrb[11].mxu1 }
 0x271   :  { %837 = vxpose.xlu0.b32.end [4/4] (short) (narrow) %v1287_v22, 32 }
 0x273   :  { %v1290_v26 = vpop.f32.mrb[20].mxu0 }
 0x274   :  { %v695_v27 = vpop.f32.mrb[21].mxu0 }
 0x275   :  { %866 = vxpose.xlu1.b32.start [1/4] (short) (narrow) %v695_v27, 32 }
 0x277   :  { %v1317_v28 = vpop.f32.mrb[12].mxu1 }
 0x278   :  { %v785_v29 = vpop.f32.mrb[13].mxu1 }
 0x279   :  { %867 = vxpose.xlu1.b32.cont [2/4] (short) (narrow) %v1290_v26, 32 }
 0x27b   :  { %v1293_v30 = vpop.f32.mrb[22].mxu0 }
 0x27c   :  { %v705_v31 = vpop.f32.mrb[23].mxu0 }
 0x27d   :  { %868 = vxpose.xlu1.b32.cont [3/4] (short) (narrow) %v705_v31, 32 }
 0x27f   :  { %v1296_v32 = vpop.f32.mrb[24].mxu0  ;;  %v1320_v33 = vpop.f32.mrb[14].mxu1 }
 0x280   :  { %v715_v34 = vpop.f32.mrb[25].mxu0  ;;  %v795_v35 = vpop.f32.mrb[15].mxu1 }
 0x281   :  { %869 = vxpose.xlu1.b32.end [4/4] (short) (narrow) %v1293_v30, 32  ;;  %898 = vxpose.xlu0.b32.start [1/4] (short) (narrow) %v715_v34, 32 }
 0x285   :  { %930 = vxpose.xlu1.b32.start [1/4] (short) (narrow) %v735_v13, 32  ;;  %899 = vxpose.xlu0.b32.cont [2/4] (short) (narrow) %v1296_v32, 32 }
 0x287   :  { %v1323_v36 = vpop.f32.mrb[16].mxu1 }
 0x288   :  { %v805_v37 = vpop.f32.mrb[17].mxu1 }
 0x289   :  { %931 = vxpose.xlu1.b32.cont [2/4] (short) (narrow) %v1302_v12, 32  ;;  %900 = vxpose.xlu0.b32.cont [3/4] (short) (narrow) %v725_v11, 32 }
 0x28b   :  { %v1326_v38 = vpop.f32.mrb[18].mxu1 }
 0x28c   :  { %v815_v39 = vpop.f32.mrb[19].mxu1 }
 0x28d   :  { %932 = vxpose.xlu1.b32.cont [3/4] (short) (narrow) %v745_v15, 32  ;;  %901 = vxpose.xlu0.b32.end [4/4] (short) (narrow) %v1299_v10, 32 }
 0x28f   :  { %v1329_v40 = vpop.f32.mrb[20].mxu1 }
 0x290   :  { %v825_v41 = vpop.f32.mrb[21].mxu1 }
 0x291   :  { %933 = vxpose.xlu1.b32.end [4/4] (short) (narrow) %v1305_v14, 32  ;;  %962 = vxpose.xlu0.b32.start [1/4] (short) (narrow) %v755_v19, 32 }
 0x295   :  { %994 = vxpose.xlu1.b32.start [1/4] (short) (narrow) %v775_v25, 32  ;;  %963 = vxpose.xlu0.b32.cont [2/4] (short) (narrow) %v1308_v17, 32 }
 0x299   :  { %995 = vxpose.xlu1.b32.cont [2/4] (short) (narrow) %v1314_v24, 32  ;;  %964 = vxpose.xlu0.b32.cont [3/4] (short) (narrow) %v765_v21, 32 }
 0x29d   :  { %996 = vxpose.xlu1.b32.cont [3/4] (short) (narrow) %v785_v29, 32  ;;  %965 = vxpose.xlu0.b32.end [4/4] (short) (narrow) %v1311_v20, 32 }
 0x2a1   :  { %997 = vxpose.xlu1.b32.end [4/4] (short) (narrow) %v1317_v28, 32  ;;  %1026 = vxpose.xlu0.b32.start [1/4] (short) (narrow) %v795_v35, 32 }
 0x2a5   :  { %1058 = vxpose.xlu1.b32.start [1/4] (short) (narrow) %v815_v39, 32  ;;  %1027 = vxpose.xlu0.b32.cont [2/4] (short) (narrow) %v1320_v33, 32 }
 0x2a9   :  { %1059 = vxpose.xlu1.b32.cont [2/4] (short) (narrow) %v1326_v38, 32  ;;  %1028 = vxpose.xlu0.b32.cont [3/4] (short) (narrow) %v805_v37, 32 }
 0x2ad   :  { %1060 = vxpose.xlu1.b32.cont [3/4] (short) (narrow) %v825_v41, 32  ;;  %1029 = vxpose.xlu0.b32.end [4/4] (short) (narrow) %v1323_v36, 32 }
 0x2b1   :  { %1061 = vxpose.xlu1.b32.end [4/4] (short) (narrow) %v1329_v40, 32 }
 0x2e5   :  { %v850_v42 = vpop.trf.xlu0 }
 0x2e6   :  { %1091 = vst.msk [vmem:[#allocation5] sm:$0xff] %vm1090_vm2, %v850_v42 }
 0x2e9   :  { %v851_v43 = vpop.trf.xlu0 }
 0x2ea   :  { %1092 = vst.msk [vmem:[#allocation5 + $0x8] sm:$0xff] %vm1090_vm2, %v851_v43 }
 0x2ed   :  { %v852_v44 = vpop.trf.xlu0 }
 0x2ee   :  { %1093 = vst.msk [vmem:[#allocation5 + $0x10] sm:$0xff] %vm1090_vm2, %v852_v44 }
 0x2f1   :  { %v853_v45 = vpop.trf.xlu0 }
 0x2f2   :  { %1094 = vst.msk [vmem:[#allocation5 + $0x18] sm:$0xff] %vm1090_vm2, %v853_v45 }
 0x2f5   :  { %v882_v46 = vpop.trf.xlu1 }
 0x2f6   :  { %1095 = vst.msk [vmem:[#allocation5 + $0x20] sm:$0xff] %vm1090_vm2, %v882_v46 }
 0x2f9   :  { %v883_v47 = vpop.trf.xlu1 }
 0x2fa   :  { %1096 = vst.msk [vmem:[#allocation5 + $0x28] sm:$0xff] %vm1090_vm2, %v883_v47 }
 0x2fd   :  { %v884_v48 = vpop.trf.xlu1 }
 0x2fe   :  { %1097 = vst.msk [vmem:[#allocation5 + $0x30] sm:$0xff] %vm1090_vm2, %v884_v48 }
 0x301   :  { %v885_v49 = vpop.trf.xlu1  ;;  %v914_v50 = vpop.trf.xlu0 }
 0x302   :  { %1098 = vst.msk [vmem:[#allocation5 + $0x38] sm:$0xff] %vm1090_vm2, %v885_v49  ;;  %1099 = vst.msk [vmem:[#allocation5 + $0x40] sm:$0xff] %vm1090_vm2, %v914_v50 }
 0x305   :  { %v946_v51 = vpop.trf.xlu1  ;;  %v915_v52 = vpop.trf.xlu0 }
 0x306   :  { %1103 = vst.msk [vmem:[#allocation5 + $0x60] sm:$0xff] %vm1090_vm2, %v946_v51  ;;  %1100 = vst.msk [vmem:[#allocation5 + $0x48] sm:$0xff] %vm1090_vm2, %v915_v52 }
 0x309   :  { %v947_v53 = vpop.trf.xlu1  ;;  %v916_v54 = vpop.trf.xlu0 }
 0x30a   :  { %1104 = vst.msk [vmem:[#allocation5 + $0x68] sm:$0xff] %vm1090_vm2, %v947_v53  ;;  %1101 = vst.msk [vmem:[#allocation5 + $0x50] sm:$0xff] %vm1090_vm2, %v916_v54 }
 0x30d   :  { %v948_v55 = vpop.trf.xlu1  ;;  %v917_v56 = vpop.trf.xlu0 }
 0x30e   :  { %1105 = vst.msk [vmem:[#allocation5 + $0x70] sm:$0xff] %vm1090_vm2, %v948_v55  ;;  %1102 = vst.msk [vmem:[#allocation5 + $0x58] sm:$0xff] %vm1090_vm2, %v917_v56 }
 0x311   :  { %v949_v57 = vpop.trf.xlu1  ;;  %v978_v58 = vpop.trf.xlu0 }
 0x312   :  { %1106 = vst.msk [vmem:[#allocation5 + $0x78] sm:$0xff] %vm1090_vm2, %v949_v57  ;;  %1107 = vst.msk [vmem:[#allocation5 + $0x80] sm:$0xff] %vm1090_vm2, %v978_v58 }
 0x315   :  { %v1010_v59 = vpop.trf.xlu1  ;;  %v979_v60 = vpop.trf.xlu0 }
 0x316   :  { %1111 = vst.msk [vmem:[#allocation5 + $0xa0] sm:$0xff] %vm1090_vm2, %v1010_v59  ;;  %1108 = vst.msk [vmem:[#allocation5 + $0x88] sm:$0xff] %vm1090_vm2, %v979_v60 }
 0x319   :  { %v1011_v61 = vpop.trf.xlu1  ;;  %v980_v62 = vpop.trf.xlu0 }
 0x31a   :  { %1112 = vst.msk [vmem:[#allocation5 + $0xa8] sm:$0xff] %vm1090_vm2, %v1011_v61  ;;  %1109 = vst.msk [vmem:[#allocation5 + $0x90] sm:$0xff] %vm1090_vm2, %v980_v62 }
 0x31d   :  { %v1012_v63 = vpop.trf.xlu1  ;;  %v981_v0 = vpop.trf.xlu0 }
 0x31e   :  { %1113 = vst.msk [vmem:[#allocation5 + $0xb0] sm:$0xff] %vm1090_vm2, %v1012_v63  ;;  %1110 = vst.msk [vmem:[#allocation5 + $0x98] sm:$0xff] %vm1090_vm2, %v981_v0 }
 0x321   :  { %v1013_v1 = vpop.trf.xlu1  ;;  %v1042_v2 = vpop.trf.xlu0 }
 0x322   :  { %1114 = vst.msk [vmem:[#allocation5 + $0xb8] sm:$0xff] %vm1090_vm2, %v1013_v1  ;;  %1115 = vst.msk [vmem:[#allocation5 + $0xc0] sm:$0xff] %vm1090_vm2, %v1042_v2 }
 0x325   :  { %v1074_v3 = vpop.trf.xlu1  ;;  %v1043_v4 = vpop.trf.xlu0 }
 0x326   :  { %1119 = vst.msk [vmem:[#allocation5 + $0xe0] sm:$0xff] %vm1090_vm2, %v1074_v3  ;;  %1116 = vst.msk [vmem:[#allocation5 + $0xc8] sm:$0xff] %vm1090_vm2, %v1043_v4 }
 0x329   :  { %v1075_v5 = vpop.trf.xlu1  ;;  %v1044_v6 = vpop.trf.xlu0 }
 0x32a   :  { %1120 = vst.msk [vmem:[#allocation5 + $0xe8] sm:$0xff] %vm1090_vm2, %v1075_v5  ;;  %1117 = vst.msk [vmem:[#allocation5 + $0xd0] sm:$0xff] %vm1090_vm2, %v1044_v6 }
 0x32d   :  { %v1076_v7 = vpop.trf.xlu1  ;;  %v1045_v8 = vpop.trf.xlu0 }
 0x32e   :  { %1121 = vst.msk [vmem:[#allocation5 + $0xf0] sm:$0xff] %vm1090_vm2, %v1076_v7  ;;  %1118 = vst.msk [vmem:[#allocation5 + $0xd8] sm:$0xff] %vm1090_vm2, %v1045_v8 }
 0x331   :  { %v1077_v9 = vpop.trf.xlu1 }
 0x332   :  { %1122 = vst.msk [vmem:[#allocation5 + $0xf8] sm:$0xff] %vm1090_vm2, %v1077_v9 }
 0x333   :  { %1388 = shalt.err (!%p1385_p12)
}
 0x334   :  { %s1389_s13 = scalar_lea.hbm %s1580_s3, 4096 }
 0x335   :  { %p1390_p13 = scmp.ne.s32.totalorder %s1580_s3, %s1389_s13  ;;  %p1393_p0 = scmp.lt.u32.totalorder %s1389_s13, %s1580_s3 }
 0x337   :  { %p1395_p1 = pnand %p1393_p0, %p1390_p13 }
 0x339   :  { %1398 = shalt.err (!%p1395_p1)
}
 0x33a   :  { %1134 = dma.vmem_to_hbm [thread:$0]  %s1129_s9, 4096, %s1580_s3, [#allocation4], %s1404_s22, %s1404_s22, %s1405_s23  }
 0x33b   :  { %1401 = dma.done.wait [#allocation4], 4096  }
 0x33c   :  { %1402 = vsyncadd [#allocation4], 4294963200 }
 0x33d   :  { %1138 = vsyncpa [#allocation3], 1 }
 0x33e   :  { %1139 = vsyncpa [#allocation4], 1 }

</bundles_post_ra>
